<compile_context>
chip_gen: v7x
topology: tpu7x:2x2x1
jax: 0.10.0
libtpu: 0.0.40
codegen_flags: <defaults>
</compile_context>

<pallas_src>
import jax
import jax.numpy as jnp
import numpy as np
from jax import lax
from jax.experimental import pallas as pl
from jax.experimental.pallas import tpu as pltpu


def _attention_gate_kernel(xpp_ref, g_ref, x4_ref, wpk_ref, bvec_ref, wo_ref,
                           cmask_ref, rowmask_ref, unflat_ref, mfull_ref,
                           scal_ref, o_ref):
    """Fused AttentionGate forward for one batch element.

    xpp_ref   : (1, 4, Cx, P)   bf16 parity planes of x, plane q=2*py+px,
                                xpp[q, cin, r*Wg+c] = x[cin, 2r+py, 2c+px]
    g_ref     : (1, Cg, P)      f32, free flat view of g (P = Hg*Wg)
    x4_ref    : (1, Cx, Hg, 2W) f32, free view of x (rows split by parity)
    wpk_ref   : (F, K)          bf16 packed xcnn/gcnn weights, tap-major (x group first)
    bvec_ref  : (F, 1)          f32 combined conv bias (bx + bg)
    wo_ref    : (1, F)          f32 1x1 conv (ocnn) weight
    cmask_ref : (2, P)          bf16 column masks: [c != 0, c != Wg-1]
    rowmask_ref:(Hg, P)         f32, rowmask[r, p] = (p // Wg == r)
    unflat_ref: (P, Wg)         f32, unflat[p, c] = (p % Wg == c)
    mfull_ref : (3Wg, 2W)       f32 packed ConvTranspose column matrices
    scal_ref  : SMEM (3,)       [ocnn bias, PReLU alpha, upsample bias]
    o_ref     : (1, Cx, Hg, 2W) f32, x * upsampled gate (same layout as x4_ref)
    """
    Cx = xpp_ref.shape[2]
    Cg = g_ref.shape[1]
    P = xpp_ref.shape[3]
    Hg = x4_ref.shape[2]
    Wg = unflat_ref.shape[1]
    pad = Wg + 1

    # Hoist SMEM scalars once.
    bo = scal_ref[0]
    alpha = scal_ref[1]
    bup = scal_ref[2]

    m0 = cmask_ref[0:1, :]          # zero where c == 0       (bf16)
    m1 = cmask_ref[1:2, :]          # zero where c == Wg - 1  (bf16)

    # ---- lane-padded (flat-P) conv-path inputs, bf16 for the MXU
    zx = jnp.zeros((Cx, pad), jnp.bfloat16)
    xpad = [jnp.concatenate([zx, xpp_ref[0, q], zx], axis=1) for q in range(4)]
    zg = jnp.zeros((Cg, pad), jnp.bfloat16)
    gpad = jnp.concatenate([zg, g_ref[0].astype(jnp.bfloat16), zg], axis=1)

    # ---- build the (K, P) patch matrix in VMEM: 9 stride-2 x taps ++ 9 stride-1 g taps
    slabs = []
    for dy in range(3):
        py, dr = (1, -1) if dy == 0 else ((0, 0) if dy == 1 else (1, 0))
        for dx in range(3):
            px, dc = (1, -1) if dx == 0 else ((0, 0) if dx == 1 else (1, 0))
            s = dr * Wg + dc
            tap = xpad[2 * py + px][:, pad + s: pad + s + P]
            if dx == 0:                 # column 2c-1 underflows at c == 0
                tap = tap * m0
            slabs.append(tap)
    for dy in range(3):
        for dx in range(3):
            s = (dy - 1) * Wg + (dx - 1)
            tap = gpad[:, pad + s: pad + s + P]
            if dx == 0:
                tap = tap * m0
            elif dx == 2:
                tap = tap * m1
            slabs.append(tap)
    patches = jnp.concatenate(slabs, axis=0)                        # (K, P) bf16

    # ---- gate path: ONE MXU dot over all 18 taps (bf16 in, f32 accum)
    acc = jnp.dot(wpk_ref[...], patches,
                  preferred_element_type=jnp.float32)               # (F, P)
    acc = acc + bvec_ref[...]                                       # conv bias
    acc = jnp.where(acc >= 0, acc, alpha * acc)                     # PReLU (shared alpha)
    low = jnp.dot(wo_ref[...], acc,
                  preferred_element_type=jnp.float32) + bo          # (1, P) 1x1 conv
    low = jax.nn.sigmoid(low)                                       # low-res attention map

    # ---- unflatten (1,P) -> (Hg,Wg): one mask multiply + one small MXU dot
    low2d = jnp.dot(low * rowmask_ref[...], unflat_ref[...],
                    preferred_element_type=jnp.float32)             # (Hg, Wg)

    # ---- ConvTranspose2d(1,1,4,s=2,p=1): single dot against packed column matrix
    zrow = jnp.zeros((1, Wg), jnp.float32)
    ap = jnp.concatenate([zrow, low2d, zrow], axis=0)               # (Hg+2, Wg)
    a3 = jnp.concatenate([ap[0:Hg], ap[1:Hg + 1], ap[2:Hg + 2]], axis=1)   # (Hg, 3Wg)
    gate = jnp.dot(a3, mfull_ref[...],
                   preferred_element_type=jnp.float32) + bup        # (Hg, 2W)

    # ---- final broadcast multiply in f32; single lane-dense store of the big output
    o_ref[...] = x4_ref[...] * gate[None, None, :, :]


def attention_gate_forward(g_nchw, x_nchw, params):
    x = x_nchw.astype(jnp.float32)
    g = g_nchw.astype(jnp.float32)
    N, Cx, H, W = x.shape
    _, Cg, Hg, Wg = g.shape
    F = params["wg"].shape[0]
    assert H == 2 * Hg and W == 2 * Wg, "x must be exactly 2x the spatial size of g"
    K = 9 * (Cx + Cg)
    P = Hg * Wg

    # ---- parity split of x for the conv path, bf16 (the only non-free rearrangement;
    #      exactly 1x the x element count, half the bytes — replaces the 2.25x f32 im2col)
    x_pp = (x.reshape(N, Cx, Hg, 2, Wg, 2)
             .transpose(0, 3, 5, 1, 2, 4)
             .reshape(N, 4, Cx, P)
             .astype(jnp.bfloat16))
    g_flat = g.reshape(N, Cg, P)                 # free view of NCHW
    x4 = x.reshape(N, Cx, Hg, 2 * W)             # free view of NCHW

    # ---- packed conv weights / biases (tap-major, x group first)
    wpk = jnp.concatenate(
        [params["wx"].transpose(0, 2, 3, 1).reshape(F, 9 * Cx),
         params["wg"].transpose(0, 2, 3, 1).reshape(F, 9 * Cg)],
        axis=1).astype(jnp.bfloat16)                                       # (F, K)
    bvec = (params["bx"] + params["bg"]).reshape(F, 1).astype(jnp.float32)
    wo2 = params["wo"].reshape(1, F).astype(jnp.float32)

    # ---- small constant matrices (column masks, unflatten, ConvTranspose columns)
    col = np.arange(P) % Wg
    cmask = jnp.asarray(np.stack([(col != 0), (col != Wg - 1)]).astype(np.float32),
                        jnp.bfloat16)                                      # (2, P)
    rowmask = jnp.asarray(((np.arange(P)[None, :] // Wg) ==
                           np.arange(Hg)[:, None]).astype(np.float32))     # (Hg, P)
    unflat = jnp.asarray((col[:, None] == np.arange(Wg)[None, :])
                         .astype(np.float32))                              # (P, Wg)

    # ConvTranspose2d(1,1,4,s=2,p=1) column matrices, packed into one (3Wg, 2W):
    #   gate[2r+py, x] = sum_{a,b} a[r+py+a-1, (x+1)//2 + b-1] * wflip[py+2a, x%2+2b]
    wflip = np.asarray(params["wup"])[0, 0, ::-1, ::-1]                    # (4, 4)
    xs = np.arange(W)
    pxv = xs % 2
    cbase = (xs + 1) // 2
    ind = np.zeros((2, Wg, W), np.float32)                                 # ind[b, c, x]
    for b in range(2):
        cc = cbase + b - 1
        valid = (cc >= 0) & (cc < Wg)
        ind[b, cc[valid], xs[valid]] = 1.0
    row_idx = np.array([[0, 2], [1, 3]])                  # [py, a] -> py + 2a
    col_idx = np.stack([pxv, pxv + 2], axis=0)            # [b, x]  -> x%2 + 2b
    wsel = wflip[row_idx[:, :, None, None], col_idx[None, None, :, :]]     # (2,2,2,W)
    mcol = np.einsum('pabx,bcx->pacx', wsel.astype(np.float32),
                     ind).reshape(4, Wg, W)
    mfull = np.zeros((3 * Wg, 2 * W), np.float32)
    mfull[0 * Wg:1 * Wg, 0:W] = mcol[0]          # py=0, uses ap[0:Hg]
    mfull[1 * Wg:2 * Wg, 0:W] = mcol[1]          # py=0, uses ap[1:Hg+1]
    mfull[1 * Wg:2 * Wg, W:2 * W] = mcol[2]      # py=1, uses ap[1:Hg+1]
    mfull[2 * Wg:3 * Wg, W:2 * W] = mcol[3]      # py=1, uses ap[2:Hg+2]
    mfull = jnp.asarray(mfull)

    scal = jnp.array([params["bo"][0], params["alpha"], params["bup"][0]], jnp.float32)

    out4 = pl.pallas_call(
        _attention_gate_kernel,
        out_shape=jax.ShapeDtypeStruct((N, Cx, Hg, 2 * W), jnp.float32),
        grid_spec=pltpu.PrefetchScalarGridSpec(
            num_scalar_prefetch=0,
            grid=(N,),
            in_specs=[
                pl.BlockSpec((1, 4, Cx, P), lambda n: (n, 0, 0, 0)),
                pl.BlockSpec((1, Cg, P), lambda n: (n, 0, 0)),
                pl.BlockSpec((1, Cx, Hg, 2 * W), lambda n: (n, 0, 0, 0)),
                pl.BlockSpec((F, K), lambda n: (0, 0)),
                pl.BlockSpec((F, 1), lambda n: (0, 0)),
                pl.BlockSpec((1, F), lambda n: (0, 0)),
                pl.BlockSpec((2, P), lambda n: (0, 0)),
                pl.BlockSpec((Hg, P), lambda n: (0, 0)),
                pl.BlockSpec((P, Wg), lambda n: (0, 0)),
                pl.BlockSpec((3 * Wg, 2 * W), lambda n: (0, 0)),
                pl.BlockSpec(memory_space=pltpu.MemorySpace.SMEM),
            ],
            out_specs=pl.BlockSpec((1, Cx, Hg, 2 * W), lambda n: (n, 0, 0, 0)),
        ),
        # Default pipeline depth (Buffered(2)); VMEM is spent on the blocks, not buffers.
        compiler_params=pltpu.CompilerParams(dimension_semantics=("parallel",)),
    )(x_pp, g_flat, x4, wpk, bvec, wo2, cmask, rowmask, unflat, mfull, scal)

    # Zero-cost view back to NCHW.
    return out4.reshape(N, Cx, H, W)


def reference_forward(g, x, params):
    """Pure-JAX reference with PyTorch conv semantics (NCHW, f32 everywhere)."""
    dn = ("NCHW", "OIHW", "NCHW")
    xc = lax.conv_general_dilated(x, params["wx"], (2, 2), [(1, 1), (1, 1)],
                                  dimension_numbers=dn) + params["bx"][None, :, None, None]
    gc = lax.conv_general_dilated(g, params["wg"], (1, 1), [(1, 1), (1, 1)],
                                  dimension_numbers=dn) + params["bg"][None, :, None, None]
    xg = xc + gc
    xg = jnp.where(xg >= 0, xg, params["alpha"] * xg)
    o = lax.conv_general_dilated(xg, params["wo"], (1, 1), [(0, 0), (0, 0)],
                                 dimension_numbers=dn) + params["bo"][None, :, None, None]
    o = jax.nn.sigmoid(o)
    wup_f = params["wup"][:, :, ::-1, ::-1]            # in=out=1, so OI swap is trivial
    up = lax.conv_general_dilated(o, wup_f, (1, 1), [(2, 2), (2, 2)],
                                  lhs_dilation=(2, 2),
                                  dimension_numbers=dn) + params["bup"][None, :, None, None]
    return x * up


if __name__ == "__main__":
    key = jax.random.PRNGKey(0)
    ks = jax.random.split(key, 10)

    N = 2
    Cg, Cx, F = 6, 4, 16        # g_filters, x_filters, filters
    H = W = 16
    Hg, Wg = H // 2, W // 2     # gcnn spatial == xcnn(stride 2) spatial

    g = jax.random.normal(ks[0], (N, Cg, Hg, Wg), jnp.float32)
    x = jax.random.normal(ks[1], (N, Cx, H, W), jnp.float32)

    params = {
        "wg": 0.1 * jax.random.normal(ks[2], (F, Cg, 3, 3), jnp.float32),
        "bg": 0.1 * jax.random.normal(ks[3], (F,), jnp.float32),
        "wx": 0.1 * jax.random.normal(ks[4], (F, Cx, 3, 3), jnp.float32),
        "bx": 0.1 * jax.random.normal(ks[5], (F,), jnp.float32),
        "wo": 0.1 * jax.random.normal(ks[6], (1, F, 1, 1), jnp.float32),
        "bo": 0.1 * jax.random.normal(ks[7], (1,), jnp.float32),
        "wup": 0.1 * jax.random.normal(ks[8], (1, 1, 4, 4), jnp.float32),
        "bup": 0.1 * jax.random.normal(ks[9], (1,), jnp.float32),
        "alpha": jnp.float32(0.25),   # nn.PReLU() default init (single shared alpha)
    }

    out = jax.block_until_ready(attention_gate_forward(g, x, params))
    ref = jax.block_until_ready(reference_forward(g, x, params))
    # Gate-path inputs/weights feed the MXU in bf16 (f32 accumulation), so tolerances are
    # relaxed vs. a pure-f32 run; the final x*gate multiply itself is exact f32.
    np.testing.assert_allclose(np.asarray(out), np.asarray(ref), rtol=4e-2, atol=4e-3)
    print("KERNEL_OK")
</pallas_src>

<mosaic_0001>
module attributes {stable_mosaic.version = 11 : i64} {
  func.func @_attention_gate_kernel(%arg0: i32, %arg1: memref<1x4x4x64xbf16, #tpu.memory_space<vmem>>, %arg2: memref<1x6x64xf32, #tpu.memory_space<vmem>>, %arg3: memref<1x4x8x32xf32, #tpu.memory_space<vmem>>, %arg4: memref<16x90xbf16, #tpu.memory_space<vmem>>, %arg5: memref<16x1xf32, #tpu.memory_space<vmem>>, %arg6: memref<1x16xf32, #tpu.memory_space<vmem>>, %arg7: memref<2x64xbf16, #tpu.memory_space<vmem>>, %arg8: memref<8x64xf32, #tpu.memory_space<vmem>>, %arg9: memref<64x8xf32, #tpu.memory_space<vmem>>, %arg10: memref<24x32xf32, #tpu.memory_space<vmem>>, %arg11: memref<3xf32, #tpu.memory_space<smem>>, %arg12: memref<1x4x8x32xf32, #tpu.memory_space<vmem>>) attributes {dimension_semantics = [#tpu.dimension_semantics<parallel>], iteration_bounds = array<i64: 2>, scalar_prefetch = 0 : i64, scratch_operands = 0 : i64, tpu.core_type = #tpu.core_type<tc>, window_params = [{transform_indices = @transform_0, window_bounds = array<i64: 1, 4, 4, 64>}, {transform_indices = @transform_1, window_bounds = array<i64: 1, 6, 64>}, {transform_indices = @transform_2, window_bounds = array<i64: 1, 4, 8, 32>}, {pipeline_mode = #tpu.pipeline_mode<synchronous>, transform_indices = @transform_3, window_bounds = array<i64: 16, 90>}, {pipeline_mode = #tpu.pipeline_mode<synchronous>, transform_indices = @transform_4, window_bounds = array<i64: 16, 1>}, {pipeline_mode = #tpu.pipeline_mode<synchronous>, transform_indices = @transform_5, window_bounds = array<i64: 1, 16>}, {pipeline_mode = #tpu.pipeline_mode<synchronous>, transform_indices = @transform_6, window_bounds = array<i64: 2, 64>}, {pipeline_mode = #tpu.pipeline_mode<synchronous>, transform_indices = @transform_7, window_bounds = array<i64: 8, 64>}, {pipeline_mode = #tpu.pipeline_mode<synchronous>, transform_indices = @transform_8, window_bounds = array<i64: 64, 8>}, {pipeline_mode = #tpu.pipeline_mode<synchronous>, transform_indices = @transform_9, window_bounds = array<i64: 24, 32>}, {transform_indices = @transform_10, window_bounds = array<i64: 3>}, {transform_indices = @transform_11, window_bounds = array<i64: 1, 4, 8, 32>}]} {
    %c0 = arith.constant 0 : index
    %0 = memref.load %arg11[%c0] : memref<3xf32, #tpu.memory_space<smem>>
    %c1 = arith.constant 1 : index
    %1 = memref.load %arg11[%c1] : memref<3xf32, #tpu.memory_space<smem>>
    %c2 = arith.constant 2 : index
    %2 = memref.load %arg11[%c2] : memref<3xf32, #tpu.memory_space<smem>>
    %c0_0 = arith.constant 0 : index
    %c0_1 = arith.constant 0 : index
    %3 = vector.load %arg7[%c0_0, %c0_1] : memref<2x64xbf16, #tpu.memory_space<vmem>>, vector<1x64xbf16>
    %c1_2 = arith.constant 1 : index
    %c0_3 = arith.constant 0 : index
    %4 = vector.load %arg7[%c1_2, %c0_3] : memref<2x64xbf16, #tpu.memory_space<vmem>>, vector<1x64xbf16>
    %cst = arith.constant 0.000000e+00 : bf16
    %5 = vector.broadcast %cst : bf16 to vector<4x9xbf16>
    %c0_4 = arith.constant 0 : index
    %c0_5 = arith.constant 0 : index
    %c0_6 = arith.constant 0 : index
    %c0_7 = arith.constant 0 : index
    %6 = vector.load %arg1[%c0_4, %c0_5, %c0_6, %c0_7] : memref<1x4x4x64xbf16, #tpu.memory_space<vmem>>, vector<1x1x4x64xbf16>
    %7 = vector.shape_cast %6 : vector<1x1x4x64xbf16> to vector<4x64xbf16>
    %8 = tpu.concatenate %5, %7, %5 in 1 : vector<4x9xbf16>, vector<4x64xbf16>, vector<4x9xbf16> -> vector<4x82xbf16>
    %c0_8 = arith.constant 0 : index
    %c1_9 = arith.constant 1 : index
    %c0_10 = arith.constant 0 : index
    %c0_11 = arith.constant 0 : index
    %9 = vector.load %arg1[%c0_8, %c1_9, %c0_10, %c0_11] : memref<1x4x4x64xbf16, #tpu.memory_space<vmem>>, vector<1x1x4x64xbf16>
    %10 = vector.shape_cast %9 : vector<1x1x4x64xbf16> to vector<4x64xbf16>
    %11 = tpu.concatenate %5, %10, %5 in 1 : vector<4x9xbf16>, vector<4x64xbf16>, vector<4x9xbf16> -> vector<4x82xbf16>
    %c0_12 = arith.constant 0 : index
    %c2_13 = arith.constant 2 : index
    %c0_14 = arith.constant 0 : index
    %c0_15 = arith.constant 0 : index
    %12 = vector.load %arg1[%c0_12, %c2_13, %c0_14, %c0_15] : memref<1x4x4x64xbf16, #tpu.memory_space<vmem>>, vector<1x1x4x64xbf16>
    %13 = vector.shape_cast %12 : vector<1x1x4x64xbf16> to vector<4x64xbf16>
    %14 = tpu.concatenate %5, %13, %5 in 1 : vector<4x9xbf16>, vector<4x64xbf16>, vector<4x9xbf16> -> vector<4x82xbf16>
    %c0_16 = arith.constant 0 : index
    %c3 = arith.constant 3 : index
    %c0_17 = arith.constant 0 : index
    %c0_18 = arith.constant 0 : index
    %15 = vector.load %arg1[%c0_16, %c3, %c0_17, %c0_18] : memref<1x4x4x64xbf16, #tpu.memory_space<vmem>>, vector<1x1x4x64xbf16>
    %16 = vector.shape_cast %15 : vector<1x1x4x64xbf16> to vector<4x64xbf16>
    %17 = tpu.concatenate %5, %16, %5 in 1 : vector<4x9xbf16>, vector<4x64xbf16>, vector<4x9xbf16> -> vector<4x82xbf16>
    %cst_19 = arith.constant 0.000000e+00 : bf16
    %18 = vector.broadcast %cst_19 : bf16 to vector<6x9xbf16>
    %c0_20 = arith.constant 0 : index
    %c0_21 = arith.constant 0 : index
    %c0_22 = arith.constant 0 : index
    %19 = vector.load %arg2[%c0_20, %c0_21, %c0_22] : memref<1x6x64xf32, #tpu.memory_space<vmem>>, vector<1x6x64xf32>
    %20 = vector.shape_cast %19 : vector<1x6x64xf32> to vector<6x64xf32>
    %21 = arith.truncf %20 : vector<6x64xf32> to vector<6x64xbf16>
    %22 = tpu.concatenate %18, %21, %18 in 1 : vector<6x9xbf16>, vector<6x64xbf16>, vector<6x9xbf16> -> vector<6x82xbf16>
    %23 = vector.extract_strided_slice %17 {offsets = [0, 0], sizes = [4, 64], strides = [1, 1]} : vector<4x82xbf16> to vector<4x64xbf16>
    %24 = vector.broadcast %3 : vector<1x64xbf16> to vector<4x64xbf16>
    %25 = arith.mulf %23, %24 : vector<4x64xbf16>
    %26 = vector.extract_strided_slice %14 {offsets = [0, 1], sizes = [4, 64], strides = [1, 1]} : vector<4x82xbf16> to vector<4x64xbf16>
    %27 = vector.extract_strided_slice %17 {offsets = [0, 1], sizes = [4, 64], strides = [1, 1]} : vector<4x82xbf16> to vector<4x64xbf16>
    %28 = vector.extract_strided_slice %11 {offsets = [0, 8], sizes = [4, 64], strides = [1, 1]} : vector<4x82xbf16> to vector<4x64xbf16>
    %29 = vector.broadcast %3 : vector<1x64xbf16> to vector<4x64xbf16>
    %30 = arith.mulf %28, %29 : vector<4x64xbf16>
    %31 = vector.extract_strided_slice %8 {offsets = [0, 9], sizes = [4, 64], strides = [1, 1]} : vector<4x82xbf16> to vector<4x64xbf16>
    %32 = vector.extract_strided_slice %11 {offsets = [0, 9], sizes = [4, 64], strides = [1, 1]} : vector<4x82xbf16> to vector<4x64xbf16>
    %33 = vector.extract_strided_slice %17 {offsets = [0, 8], sizes = [4, 64], strides = [1, 1]} : vector<4x82xbf16> to vector<4x64xbf16>
    %34 = vector.broadcast %3 : vector<1x64xbf16> to vector<4x64xbf16>
    %35 = arith.mulf %33, %34 : vector<4x64xbf16>
    %36 = vector.extract_strided_slice %14 {offsets = [0, 9], sizes = [4, 64], strides = [1, 1]} : vector<4x82xbf16> to vector<4x64xbf16>
    %37 = vector.extract_strided_slice %17 {offsets = [0, 9], sizes = [4, 64], strides = [1, 1]} : vector<4x82xbf16> to vector<4x64xbf16>
    %38 = vector.extract_strided_slice %22 {offsets = [0, 0], sizes = [6, 64], strides = [1, 1]} : vector<6x82xbf16> to vector<6x64xbf16>
    %39 = vector.broadcast %3 : vector<1x64xbf16> to vector<6x64xbf16>
    %40 = arith.mulf %38, %39 : vector<6x64xbf16>
    %41 = vector.extract_strided_slice %22 {offsets = [0, 1], sizes = [6, 64], strides = [1, 1]} : vector<6x82xbf16> to vector<6x64xbf16>
    %42 = vector.extract_strided_slice %22 {offsets = [0, 2], sizes = [6, 64], strides = [1, 1]} : vector<6x82xbf16> to vector<6x64xbf16>
    %43 = vector.broadcast %4 : vector<1x64xbf16> to vector<6x64xbf16>
    %44 = arith.mulf %42, %43 : vector<6x64xbf16>
    %45 = vector.extract_strided_slice %22 {offsets = [0, 8], sizes = [6, 64], strides = [1, 1]} : vector<6x82xbf16> to vector<6x64xbf16>
    %46 = vector.broadcast %3 : vector<1x64xbf16> to vector<6x64xbf16>
    %47 = arith.mulf %45, %46 : vector<6x64xbf16>
    %48 = vector.extract_strided_slice %22 {offsets = [0, 9], sizes = [6, 64], strides = [1, 1]} : vector<6x82xbf16> to vector<6x64xbf16>
    %49 = vector.extract_strided_slice %22 {offsets = [0, 10], sizes = [6, 64], strides = [1, 1]} : vector<6x82xbf16> to vector<6x64xbf16>
    %50 = vector.broadcast %4 : vector<1x64xbf16> to vector<6x64xbf16>
    %51 = arith.mulf %49, %50 : vector<6x64xbf16>
    %52 = vector.extract_strided_slice %22 {offsets = [0, 16], sizes = [6, 64], strides = [1, 1]} : vector<6x82xbf16> to vector<6x64xbf16>
    %53 = vector.broadcast %3 : vector<1x64xbf16> to vector<6x64xbf16>
    %54 = arith.mulf %52, %53 : vector<6x64xbf16>
    %55 = vector.extract_strided_slice %22 {offsets = [0, 17], sizes = [6, 64], strides = [1, 1]} : vector<6x82xbf16> to vector<6x64xbf16>
    %56 = vector.extract_strided_slice %22 {offsets = [0, 18], sizes = [6, 64], strides = [1, 1]} : vector<6x82xbf16> to vector<6x64xbf16>
    %57 = vector.broadcast %4 : vector<1x64xbf16> to vector<6x64xbf16>
    %58 = arith.mulf %56, %57 : vector<6x64xbf16>
    %59 = tpu.concatenate %25, %26, %27, %30, %31, %32, %35, %36, %37, %40, %41, %44, %47, %48, %51, %54 in 0 : vector<4x64xbf16>, vector<4x64xbf16>, vector<4x64xbf16>, vector<4x64xbf16>, vector<4x64xbf16>, vector<4x64xbf16>, vector<4x64xbf16>, vector<4x64xbf16>, vector<4x64xbf16>, vector<6x64xbf16>, vector<6x64xbf16>, vector<6x64xbf16>, vector<6x64xbf16>, vector<6x64xbf16>, vector<6x64xbf16>, vector<6x64xbf16> -> vector<78x64xbf16>
    %60 = tpu.concatenate %55, %58 in 0 : vector<6x64xbf16>, vector<6x64xbf16> -> vector<12x64xbf16>
    %61 = tpu.concatenate %59, %60 in 0 : vector<78x64xbf16>, vector<12x64xbf16> -> vector<90x64xbf16>
    %c0_23 = arith.constant 0 : index
    %c0_24 = arith.constant 0 : index
    %62 = vector.load %arg4[%c0_23, %c0_24] : memref<16x90xbf16, #tpu.memory_space<vmem>>, vector<16x90xbf16>
    %cst_25 = arith.constant dense<0.000000e+00> : vector<16x64xf32>
    %63 = tpu.matmul %62, %61, %cst_25 {dimension_numbers = #tpu.dot_dimension_numbers<[1], [0], [0], [1], [0, 0, 1, 1], [], []>} : vector<16x90xbf16>, vector<90x64xbf16>, vector<16x64xf32> -> vector<16x64xf32>
    %c0_26 = arith.constant 0 : index
    %c0_27 = arith.constant 0 : index
    %64 = vector.load %arg5[%c0_26, %c0_27] : memref<16x1xf32, #tpu.memory_space<vmem>>, vector<16x1xf32>
    %65 = vector.broadcast %64 : vector<16x1xf32> to vector<16x64xf32>
    %66 = arith.addf %63, %65 : vector<16x64xf32>
    %cst_28 = arith.constant 0.000000e+00 : f32
    %67 = vector.broadcast %cst_28 : f32 to vector<16x64xf32>
    %68 = arith.cmpf oge, %66, %67 : vector<16x64xf32>
    %69 = vector.broadcast %1 : f32 to vector<16x64xf32>
    %70 = arith.mulf %69, %66 : vector<16x64xf32>
    %71 = arith.select %68, %66, %70 : vector<16x64xi1>, vector<16x64xf32>
    %c0_29 = arith.constant 0 : index
    %c0_30 = arith.constant 0 : index
    %72 = vector.load %arg6[%c0_29, %c0_30] : memref<1x16xf32, #tpu.memory_space<vmem>>, vector<1x16xf32>
    %cst_31 = arith.constant dense<0.000000e+00> : vector<1x64xf32>
    %73 = tpu.matmul %72, %71, %cst_31 {dimension_numbers = #tpu.dot_dimension_numbers<[1], [0], [0], [1], [0, 0, 1, 1], [], []>} : vector<1x16xf32>, vector<16x64xf32>, vector<1x64xf32> -> vector<1x64xf32>
    %74 = vector.broadcast %0 : f32 to vector<1x64xf32>
    %75 = arith.addf %73, %74 : vector<1x64xf32>
    %76 = arith.negf %75 : vector<1x64xf32>
    %77 = math.exp %76 : vector<1x64xf32>
    %cst_32 = arith.constant 1.000000e+00 : f32
    %78 = vector.broadcast %cst_32 : f32 to vector<1x64xf32>
    %79 = arith.addf %78, %77 : vector<1x64xf32>
    %80 = arith.divf %78, %79 : vector<1x64xf32>
    %c0_33 = arith.constant 0 : index
    %c0_34 = arith.constant 0 : index
    %81 = vector.load %arg8[%c0_33, %c0_34] : memref<8x64xf32, #tpu.memory_space<vmem>>, vector<8x64xf32>
    %82 = vector.broadcast %80 : vector<1x64xf32> to vector<8x64xf32>
    %83 = arith.mulf %82, %81 : vector<8x64xf32>
    %c0_35 = arith.constant 0 : index
    %c0_36 = arith.constant 0 : index
    %84 = vector.load %arg9[%c0_35, %c0_36] : memref<64x8xf32, #tpu.memory_space<vmem>>, vector<64x8xf32>
    %cst_37 = arith.constant dense<0.000000e+00> : vector<8x8xf32>
    %85 = tpu.matmul %83, %84, %cst_37 {dimension_numbers = #tpu.dot_dimension_numbers<[1], [0], [0], [1], [0, 0, 1, 1], [], []>} : vector<8x64xf32>, vector<64x8xf32>, vector<8x8xf32> -> vector<8x8xf32>
    %cst_38 = arith.constant 0.000000e+00 : f32
    %86 = vector.broadcast %cst_38 : f32 to vector<1x8xf32>
    %87 = tpu.concatenate %86, %85, %86 in 0 : vector<1x8xf32>, vector<8x8xf32>, vector<1x8xf32> -> vector<10x8xf32>
    %88 = vector.extract_strided_slice %87 {offsets = [0, 0], sizes = [8, 8], strides = [1, 1]} : vector<10x8xf32> to vector<8x8xf32>
    %89 = vector.extract_strided_slice %87 {offsets = [1, 0], sizes = [8, 8], strides = [1, 1]} : vector<10x8xf32> to vector<8x8xf32>
    %90 = vector.extract_strided_slice %87 {offsets = [2, 0], sizes = [8, 8], strides = [1, 1]} : vector<10x8xf32> to vector<8x8xf32>
    %91 = tpu.concatenate %88, %89, %90 in 1 : vector<8x8xf32>, vector<8x8xf32>, vector<8x8xf32> -> vector<8x24xf32>
    %c0_39 = arith.constant 0 : index
    %c0_40 = arith.constant 0 : index
    %92 = vector.load %arg10[%c0_39, %c0_40] : memref<24x32xf32, #tpu.memory_space<vmem>>, vector<24x32xf32>
    %cst_41 = arith.constant dense<0.000000e+00> : vector<8x32xf32>
    %93 = tpu.matmul %91, %92, %cst_41 {dimension_numbers = #tpu.dot_dimension_numbers<[1], [0], [0], [1], [0, 0, 1, 1], [], []>} : vector<8x24xf32>, vector<24x32xf32>, vector<8x32xf32> -> vector<8x32xf32>
    %94 = vector.broadcast %2 : f32 to vector<8x32xf32>
    %95 = arith.addf %93, %94 : vector<8x32xf32>
    %c0_42 = arith.constant 0 : index
    %c0_43 = arith.constant 0 : index
    %c0_44 = arith.constant 0 : index
    %c0_45 = arith.constant 0 : index
    %96 = vector.load %arg3[%c0_42, %c0_43, %c0_44, %c0_45] : memref<1x4x8x32xf32, #tpu.memory_space<vmem>>, vector<1x4x8x32xf32>
    %97 = vector.shape_cast %95 : vector<8x32xf32> to vector<1x1x8x32xf32>
    %98 = vector.broadcast %97 : vector<1x1x8x32xf32> to vector<1x4x8x32xf32>
    %99 = arith.mulf %96, %98 : vector<1x4x8x32xf32>
    %c0_46 = arith.constant 0 : index
    %c0_47 = arith.constant 0 : index
    %c0_48 = arith.constant 0 : index
    %c0_49 = arith.constant 0 : index
    %100 = vector.load %arg12[%c0_46, %c0_47, %c0_48, %c0_49] : memref<1x4x8x32xf32, #tpu.memory_space<vmem>>, vector<1x4x8x32xf32>
    tpu.vector_store %arg12[%c0_46, %c0_47, %c0_48, %c0_49], %99 {strides = array<i32>} : memref<1x4x8x32xf32, #tpu.memory_space<vmem>>, vector<1x4x8x32xf32>,
    return
  }
  func.func @transform_0(%arg0: i32) -> (i32, i32, i32, i32) {
    %c0_i32 = arith.constant 0 : i32
    %c0_i32_0 = arith.constant 0 : i32
    %c0_i32_1 = arith.constant 0 : i32
    %c0_i32_2 = arith.constant 0 : i32
    return %arg0, %c0_i32, %c0_i32_0, %c0_i32_1 : i32, i32, i32, i32
  }
  func.func @transform_1(%arg0: i32) -> (i32, i32, i32) {
    %c0_i32 = arith.constant 0 : i32
    %c0_i32_0 = arith.constant 0 : i32
    %c0_i32_1 = arith.constant 0 : i32
    return %arg0, %c0_i32, %c0_i32_0 : i32, i32, i32
  }
  func.func @transform_2(%arg0: i32) -> (i32, i32, i32, i32) {
    %c0_i32 = arith.constant 0 : i32
    %c0_i32_0 = arith.constant 0 : i32
    %c0_i32_1 = arith.constant 0 : i32
    %c0_i32_2 = arith.constant 0 : i32
    return %arg0, %c0_i32, %c0_i32_0, %c0_i32_1 : i32, i32, i32, i32
  }
  func.func @transform_3(%arg0: i32) -> (i32, i32) {
    %c0_i32 = arith.constant 0 : i32
    %c0_i32_0 = arith.constant 0 : i32
    %c0_i32_1 = arith.constant 0 : i32
    return %c0_i32, %c0_i32_0 : i32, i32
  }
  func.func @transform_4(%arg0: i32) -> (i32, i32) {
    %c0_i32 = arith.constant 0 : i32
    %c0_i32_0 = arith.constant 0 : i32
    %c0_i32_1 = arith.constant 0 : i32
    return %c0_i32, %c0_i32_0 : i32, i32
  }
  func.func @transform_5(%arg0: i32) -> (i32, i32) {
    %c0_i32 = arith.constant 0 : i32
    %c0_i32_0 = arith.constant 0 : i32
    %c0_i32_1 = arith.constant 0 : i32
    return %c0_i32, %c0_i32_0 : i32, i32
  }
  func.func @transform_6(%arg0: i32) -> (i32, i32) {
    %c0_i32 = arith.constant 0 : i32
    %c0_i32_0 = arith.constant 0 : i32
    %c0_i32_1 = arith.constant 0 : i32
    return %c0_i32, %c0_i32_0 : i32, i32
  }
  func.func @transform_7(%arg0: i32) -> (i32, i32) {
    %c0_i32 = arith.constant 0 : i32
    %c0_i32_0 = arith.constant 0 : i32
    %c0_i32_1 = arith.constant 0 : i32
    return %c0_i32, %c0_i32_0 : i32, i32
  }
  func.func @transform_8(%arg0: i32) -> (i32, i32) {
    %c0_i32 = arith.constant 0 : i32
    %c0_i32_0 = arith.constant 0 : i32
    %c0_i32_1 = arith.constant 0 : i32
    return %c0_i32, %c0_i32_0 : i32, i32
  }
  func.func @transform_9(%arg0: i32) -> (i32, i32) {
    %c0_i32 = arith.constant 0 : i32
    %c0_i32_0 = arith.constant 0 : i32
    %c0_i32_1 = arith.constant 0 : i32
    return %c0_i32, %c0_i32_0 : i32, i32
  }
  func.func @transform_10(%arg0: i32) -> i32 {
    %c0_i32 = arith.constant 0 : i32
    %c0_i32_0 = arith.constant 0 : i32
    return %c0_i32 : i32
  }
  func.func @transform_11(%arg0: i32) -> (i32, i32, i32, i32) {
    %c0_i32 = arith.constant 0 : i32
    %c0_i32_0 = arith.constant 0 : i32
    %c0_i32_1 = arith.constant 0 : i32
    %c0_i32_2 = arith.constant 0 : i32
    return %arg0, %c0_i32, %c0_i32_0, %c0_i32_1 : i32, i32, i32, i32
  }
}

</mosaic_0001>

<bundles_post_ra>
// kernel: tpu_custom_call.1
= control target key start
LH: loop header
LB: loop body
LE: loop exit
PB: predicated region body
PF: predicated region fallthrough
CT: control target
= control target key end

     0   :  { %s1746_s0 = inlined_call_operand.vmem [shape: bf16[2,4,4,64], index: 0, kind: input, shape index: {}]   ;;  %s1747_s1 = inlined_call_operand.vmem [shape: f32[2,6,64], index: 1, kind: input, shape index: {}]   ;;  %s1748_s2 = inlined_call_operand.vmem [shape: f32[2,4,8,32], index: 2, kind: input, shape index: {}]   ;;  %s1749_s3 = inlined_call_operand.vmem [shape: bf16[16,90], index: 3, kind: input, shape index: {}]   ;;  %s1750_s4 = inlined_call_operand.vmem [shape: f32[16,1], index: 4, kind: input, shape index: {}]   ;;  %s1751_s5 = inlined_call_operand.vmem [shape: f32[1,16], index: 5, kind: input, shape index: {}]   ;;  %s1752_s6 = inlined_call_operand.vmem [shape: bf16[2,64], index: 6, kind: input, shape index: {}]   ;;  %s1753_s7 = inlined_call_operand.vmem [shape: f32[8,64], index: 7, kind: input, shape index: {}]   ;;  %s1754_s8 = inlined_call_operand.vmem [shape: f32[64,8], index: 8, kind: input, shape index: {}]   ;;  %s1755_s9 = inlined_call_operand.vmem [shape: f32[24,32], index: 9, kind: input, shape index: {}]   ;;  %s1756_s10 = inlined_call_operand.vmem [shape: f32[3], index: 10, kind: input, shape index: {}]   ;;  %s1757_s11 = inlined_call_operand.hbm [shape: f32[2,4,8,32], index: 11, kind: output, shape index: {}]  }
   0x1   :  { %1761 = sst [smem:[#allocation8_spill]] %s1746_s0 }
   0x2   :  { %1762 = sst [smem:[#allocation9_spill]] %s1747_s1 }
   0x3   :  { %1763 = sst [smem:[#allocation10_spill]] %s1749_s3 }
   0x4   :  { %1764 = sst [smem:[#allocation11_spill]] %s1750_s4 }
   0x5   :  { %16 = vsyncpa [#allocation4], 0 }
   0x6   :  { %17 = vsyncpa [#allocation3], 0 }
   0x7   :  { %19 = vsyncpa [#allocation3 + $0x1], 0  ;;  %s1491_s17 = smov 0   ;;  %s1493_s18 = smov 0  }
   0x8   :  { %s1495_s19 = smov 0   ;;  %s1497_s20 = smov 0  }
   0x9 LB: > { %s1512_s21 = sadd.s32 4294967295, %s1409_s20   ;;  %s1126_s22 = sadd.s32 4294967294, %s1409_s20   ;;  %s1409_s20 = sphi %s1497_s20, %s1777_s20   ;;  %s1405_s19 = sphi %s1495_s19, %s1776_s19   ;;  %s1401_s18 = sphi %s1493_s18, %s1775_s18   ;;  %s1397_s17 = sphi %s1491_s17, %s1774_s17  }
   0xa   : > { %s1516_s23 = sadd.s32 1, %s1409_s20   ;;  %s278_s24 = sadd.s32 1, %s1405_s19 }
   0xb   : > { %s275_s25 = ssub.s32 %s1409_s20, %s1516_s23  ;;  %p288_p0 = scmp.ne.s32.totalorder %s1405_s19, %s1401_s18 }
   0xc   : > { %p276_p1 = scmp.eq.s32.totalorder %s275_s25, 0  ;;  %p289_p2 = scmp.eq.s32.totalorder %s1512_s21, 1 }
   0xd   : > { %p294_p3 = scmp.ne.s32.totalorder %s1401_s18, %s1397_s17  ;;  %p295_p4 = scmp.eq.s32.totalorder %s1126_s22, 1 }
   0xe   : > { %s1527_s26 = scalar_select %p276_p1, %s1405_s19, %s278_s24  }
   0xf   : > { %p1529_p5 = por %p289_p2, %p288_p0  ;;  %p1533_p6 = por %p295_p4, %p294_p3 }
  0x10   : > { %p1127_p7 = scmp.ge.s32.totalorder %s1409_s20, 1  ;;  %p302_p8 = scmp.lt.s32.totalorder %s1409_s20, 3 }
  0x11   : > { %p1267_p9 = scmp.eq.s32.totalorder %s1512_s21, 0  ;;  %s336_s13 = sshll.u32 %s1756_s10, 4  ;;  %s337_s13 = int_to_ptr.vmem [resolvable:$true] %s336_s13 }
  0x12   : > { %p1540_p10 = pnand %p1127_p7, %p302_p8  ;;  %s1328_s14 = scalar_lea.vmem %s337_s13, 16 }
  0x13   : > { %p1329_p13 = scmp.ne.s32.totalorder %s337_s13, %s1328_s14  ;;  %p1336_p3 = scmp.lt.s32.totalorder %s337_s13, %s337_s13 }
  0x14   : > { %p1259_p11 = pneg %p1540_p10  ;;  %p1337_p4 = scmp.lt.s32.totalorder %s1328_s14, %s1328_s14 }
  0x16   : > { %p1260_p12 = pnand %p1267_p9, %p1259_p11  ;;  %p1338_p7 = por %p1337_p4, %p1336_p3 }
  0x18   : > { %p1330_p0 = pneg %p1260_p12 }
  0x1a   : > { %p1331_p1 = pnand %p1330_p0, %p1329_p13 }
  0x1c   : > { %p1332_p2 = pneg %p1331_p1 }
  0x1e   : > { %p1339_p8 = pnand %p1338_p7, %p1332_p2 }
  0x20   : > { %1342 = shalt.err (!%p1339_p8)
}
  0x21   : > { %s1411_s15 = smov [#allocation2]   ;;  %372 = sbr.rel (%p1540_p10) target bundleno = 1453 (0x5ad), region = 64 }
  0x22   : > { %1262 = dma.vmem_to_smem (!%p1260_p12), %s337_s13, 16, %s1411_s15, [#allocation4]  }
  0x28   : > { %1388 = dma.done.wait (%p1267_p9), [#allocation4], 16  }
  0x29   : > { %1390 = vsyncadd (%p1267_p9), [#allocation4], 4294967280 }
  0x2a   : > { %378 = sfence }
  0x2b   : > { %p422_p11 = scmp.lt.s32.totalorder %s1512_s21, 1  ;;  %v440_v0 = vld [vmem:[%s1752_s6] sm:$0x1]  ;;  %v517_v1 = vlaneseq  ;;  %s1768_s0 = sld [smem:[#allocation8_spill]]  ;;  %vm452_vm0 = vcmask 72704   ;;  %vm456_vm1 = vcmask 596992  }
  0x2c   : > { %v529_v3 = vshrl.u32 %v440_v0, 16  ;;  %s1769_s1 = sld [smem:[#allocation9_spill]]  ;;  %s1412_s16 = smov 9   ;;  %v515_v8 = vpack.i.b16 %v440_v0, %v440_v0  ;;  %v1418_v20 = vmov 0.0   ;;  %vm1425_vm2 = vmmov 0  }
  0x2d   : > { %s1562_s24 = scalar_select %p422_p11, %s1512_s21, 1  ;;  %v518_v2 = vshrl.u32 %v517_v1, 7  ;;  %1184 = vmatprep.subr.bf16.mxu0 %v1418_v20  ;;  %1196 = vmatprep.mubr.msk.bf16.mxu0 %vm1425_vm2, %v1418_v20  ;;  %vm632_vm3 = vcmask 1042432   ;;  %v1426_v58 = vmov 0   ;;  %vm606_vm4 = vcmask 1041408  }
  0x2e   : > { %v530_v6 = vpack.i.b16 %v529_v3, %v529_v3  ;;  %s1413_s22 = smov 18   ;;  %s1758_s29 = smov 8   ;;  %1204 = vmatprep.mubr.msk.f32.mxu1 %vm1425_vm2, %v1418_v20  ;;  %1321 = vset.pattern.permute.xlu0 %v1426_v58  ;;  %vm610_vm5 = vcmask 1043456   ;;  %vm613_vm6 = vcmask 1045504   ;;  %vm628_vm7 = vcmask 1044480  }
  0x2f   : > { %s1158_s25 = sshll.u32 %s1562_s24, 3  ;;  %v1571_v5 = vsub.s32 0, %v518_v2  ;;  %s1760_s30 = smov 16   ;;  %1322 = vset.pattern.permute.xlu1 %v1426_v58  ;;  %vm639_vm8 = vcmask 1040384   ;;  %vm654_vm9 = vcmask 1046528   ;;  %vm677_vm10 = vcmask 736256  }
  0x30   : > { %s1417_s13 = smov 10   ;;  %s1420_s14 = smov 120   ;;  %vm733_vm13 = vcmask 130048   ;;  %v826_v58 = vld [vmem:[%s1754_s8 + $0x38] sm:$0xff]  ;;  %vm827_vm14 = vcmask 523264   ;;  %vm920_vm15 = vcmask 64512  }
  0x31   : > { %s426_s12 = scalar_lea.vmem %s1768_s0, %s1158_s25  ;;  %v535_v11 = vrot.slane %v530_v6, %v1571_v5  ;;  %v1575_v12 = vrot.slane %v515_v8, %v1571_v5  ;;  %s1770_s4 = sld [smem:[#allocation11_spill]] }
  0x32   : > { %v1142_v4 = vld.sshfl [vmem:[%s426_s12 + $0x2] sm:$0x3 pattern:$0x76325410]  ;;  %s430_s15 = scalar_lea.vmem %s1769_s1, %s1158_s25  ;;  %s1415_s25 = smov 2  }
  0x33   : > { %468 = vrot.lane.b32.xlu1 %v1142_v4, %s1412_s16  ;;  %v505_v7 = vld [vmem:[%s430_s15] sm:$0x3f]  ;;  %v1146_v13 = vld.sshfl [vmem:[%s426_s12 + $0x6] sm:$0x3 pattern:$0x76325410] }
  0x34   : > { %v506_v9 = vpack.c.bf16 %v505_v7, %v505_v7  ;;  %v1144_v10 = vld.sshfl [vmem:[%s426_s12 + $0x4] sm:$0x3 pattern:$0x76325410]  ;;  %s1421_s15 = smov 119   ;;  %s1771_s3 = sld [smem:[#allocation10_spill]] }
  0x35   : > { %v1140_v14 = vld.sshfl [vmem:[%s426_s12] sm:$0x3 pattern:$0x76325410]  ;;  %s1419_s12 = smov 127   ;;  %s437_s0 = sld [smem:[#allocation2]] }
  0x36   : > { %508 = vrot.lane.b32.xlu0 %v506_v9, %s1412_s16 }
  0x37   : > { %484 = vrot.lane.b32.xlu1 %v1144_v10, %s1412_s16  ;;  %v660_v56 = vld [vmem:[%s1770_s4] sm:$0xff]  ;;  %v661_v3 = vld [vmem:[%s1770_s4 + $0x8] sm:$0xff] }
  0x3a   : > { %550 = vrot.lane.b32.xlu0 %v535_v11, %s1413_s22  ;;  %s1423_s22 = smov 118  }
  0x3b   : > { %523 = vrot.lane.b32.xlu1 %v1575_v12, %s1758_s29  ;;  %s1772_s29 = smov 16  }
  0x3e   : > { %499 = vrot.lane.b32.xlu0 %v1146_v13, %s1412_s16 }
  0x3f   : > { %537 = vrot.lane.b32.xlu1 %v535_v11, %s1415_s25  ;;  %s1424_s25 = smov 112  }
  0x42   : > { %450 = vrot.lane.b32.xlu0 %v1140_v14, %s1412_s16  ;;  %s1422_s16 = smov 126  }
  0x43   : > { %546 = vrot.lane.b32.xlu1 %v1575_v12, %s1760_s30  ;;  %s1139_s30 = sld [smem:[#allocation2 + $0x2]] }
  0x46   : > { %542 = vrot.lane.b32.xlu0 %v535_v11, %s1417_s13  ;;  %s1138_s13 = sld [smem:[#allocation2 + $0x1]] }
  0xa5   : > { %v469_v15 = vpop.permute.xlu1 %468 }
  0xa6   : > { %v471_v16 = vsel %vm452_vm0, 0, %v469_v15 }
  0xa7   : > { %v472_v22 = vsel %vm456_vm1, %v471_v16, 0 }
  0xa8   : > { %v509_v17 = vpop.permute.xlu0 %508  ;;  %v570_v34 = vrot.slane %v472_v22, 6 }
  0xa9   : > { %v511_v18 = vsel %vm452_vm0, 0, %v509_v17  ;;  %v485_v19 = vpop.permute.xlu1 %484 }
  0xaa   : > { %v487_v21 = vsel %vm452_vm0, 0, %v485_v19  ;;  %v1588_v24 = vsel %vm456_vm1, %v511_v18, 0 }
  0xab   : > { %v488_v23 = vsel %vm456_vm1, %v487_v21, 0  ;;  %v585_v44 = vrot.slane %v1588_v24, 3  ;;  %v595_v53 = vrot.slane %v1588_v24, 2  ;;  %v528_v9 = vmul.bf16 %v1575_v12, %v1588_v24 }
  0xac   : > { %v555_v25 = vrot.slane %v488_v23, 6  ;;  %v551_v26 = vpop.permute.xlu0 %550  ;;  %v577_v40 = vrot.slane %v488_v23, 2 }
  0xad   : > { %v553_v27 = vmul.bf16 %v551_v26, %v1588_v24  ;;  %v524_v28 = vpop.permute.xlu1 %523  ;;  %v583_v15 = vrot.slane %v528_v9, 6  ;;  %v924_v9 = vld [vmem:[%s1755_s9 + $0x8] sm:$0xff] }
  0xae   : > { %v526_v29 = vmul.bf16 %v524_v28, %v472_v22  ;;  %556 = vrot.lane.b32.xlu1 %v555_v25, %s1419_s12  ;;  %v541_v43 = vmul.bf16 %v524_v28, %v1588_v24 }
  0xaf   : > { %v645_v30 = vrot.slane %v553_v27, 5 }
  0xb0   : > { %v500_v31 = vpop.permute.xlu0 %499  ;;  %v563_v32 = vrot.slane %v526_v29, 2  ;;  %v592_v48 = vrot.slane %v541_v43, 5 }
  0xb1   : > { %v502_v33 = vsel %vm452_vm0, 0, %v500_v31  ;;  %646 = vrot.lane.b32.xlu0 %v645_v30, %s1419_s12  ;;  %v538_v46 = vpop.permute.xlu1 %537  ;;  %v1323_v31 = vld [vmem:[%s1771_s3] sm:$0xff]   ;;  %s1429_s3 = smov [#allocation5]  }
  0xb2   : > { %v503_v35 = vsel %vm456_vm1, %v502_v33, 0  ;;  %564 = vrot.lane.b32.xlu1 %v563_v32, %s1420_s14  ;;  %v540_v49 = vmul.bf16 %v538_v46, %v1588_v24  ;;  %v1428_v32 = vmov 0.0|0.0  }
  0xb3   : > { %v559_v36 = vrot.slane %v503_v35, 4  ;;  %v527_v39 = vmul.bf16 %v524_v28, %v503_v35  ;;  %v521_v61 = vmul.bf16 %v1575_v12, %v503_v35  ;;  %1235 = vmatprep.subr.bf16.mxu1 %v1428_v32 }
  0xb4   : > { %v451_v37 = vpop.permute.xlu0 %450 }
  0xb5   : > { %v455_v38 = vsel %vm452_vm0, 0, %v451_v37  ;;  %560 = vrot.lane.b32.xlu0 %v559_v36, %s1419_s12  ;;  %v574_v42 = vrot.slane %v527_v39, 4  ;;  %v547_v50 = vpop.permute.xlu1 %546  ;;  %vm927_vm0 = vcmask 195584  }
  0xb6   : > { %v457_v41 = vsel %vm456_vm1, %v455_v38, 0  ;;  %571 = vrot.lane.b32.xlu1 %v570_v34, %s1421_s15  ;;  %v549_v52 = vmul.bf16 %v547_v50, %v1588_v24  ;;  %vm1009_vm1 = vcmask 261120  }
  0xb8   : > { %v543_v45 = vpop.permute.xlu0 %542  ;;  %v603_v54 = vrot.slane %v549_v52, 4  ;;  %v822_v52 = vld [vmem:[%s1754_s8 + $0x18] sm:$0xff] }
  0xb9   : > { %567 = vrot.lane.b32.xlu0 %v457_v41, %s1421_s15  ;;  %v545_v47 = vmul.bf16 %v543_v45, %v1588_v24 }
  0xba   : > { %578 = vrot.lane.b32.xlu1 %v577_v40, %s1421_s15 }
  0xbb   : > { %v599_v51 = vrot.slane %v545_v47, 7  ;;  %v731_v47 = vld [vmem:[%s1751_s5] sm:$0x1] }
  0xbd   : > { %575 = vrot.lane.b32.xlu0 %v574_v42, %s1420_s14 }
  0xbe   : > { %586 = vrot.lane.b32.xlu1 %v585_v44, %s1419_s12  ;;  %s419_s12 = sand.u32 1, %s1401_s18  }
  0xc1   : > { %580 = vrot.lane.b32.xlu0 %v503_v35, %s1421_s15  ;;  %v726_v35 = vstv %s1138_s13  ;;  %s1160_s13 = sshll.u32 %s1512_s21, 9  ;;  %s1704_s21 = scalar_lea.sflag [#allocation3], %s419_s12 }
  0xc2   : > { %593 = vrot.lane.b32.xlu1 %v592_v48, %s1420_s14  ;;  %s1427_s14 = smov 111   ;;  %v819_v48 = vld [vmem:[%s1754_s8] sm:$0xff]  ;;  %s1700_s4 = scalar_lea.hbm %s1757_s11, %s1160_s13 }
  0xc5   : > { %589 = vrot.lane.b32.xlu0 %v540_v49, %s1422_s16  ;;  %v820_v49 = vld [vmem:[%s1754_s8 + $0x8] sm:$0xff] }
  0xc6   : > { %600 = vrot.lane.b32.xlu1 %v599_v51, %s1423_s22  ;;  %v1239_v50 = vpack.c.bf16 %v820_v49, %v819_v48  ;;  %v821_v51 = vld [vmem:[%s1754_s8 + $0x10] sm:$0xff] }
  0xc9   : > { %596 = vrot.lane.b32.xlu0 %v595_v53, %s1421_s15  ;;  %v1242_v53 = vpack.c.bf16 %v822_v52, %v821_v51  ;;  %s1132_s15 = sshll.u32 %s419_s12, 5 }
  0xcd   : > { %604 = vrot.lane.b32.xlu0 %v603_v54, %s1424_s25  ;;  %v823_v54 = vld [vmem:[%s1754_s8 + $0x20] sm:$0xff] }
  0xd1   : > { %664 = vperm.xlu0 %1321, %v660_v56  }
 0x120   : > { %v557_v55 = vpop.permute.xlu1 %556 }
 0x121   : > { %v609_v63 = vsel %vm606_vm4, %v521_v61, %v557_v55  ;;  %v824_v55 = vld [vmem:[%s1754_s8 + $0x28] sm:$0xff] }
 0x122   : > { %v1245_v56 = vpack.c.bf16 %v824_v55, %v823_v54 }
 0x123   : > { %v647_v57 = vpop.permute.xlu0 %646 }
 0x124   : > { %v649_v59 = vsel %vm632_vm3, %v1588_v24, %v647_v57  ;;  %v565_v60 = vpop.permute.xlu1 %564  ;;  %v825_v57 = vld [vmem:[%s1754_s8 + $0x30] sm:$0xff] }
 0x125   : > { %v651_v62 = vrot.slane %v649_v59, 1  ;;  %v1248_v59 = vpack.c.bf16 %v826_v58, %v825_v57 }
 0x127   : > { %652 = vrot.lane.b32.xlu1 %v651_v62, %s1427_s14  ;;  %v561_v0 = vpop.permute.xlu0 %560  ;;  %s1159_s14 = sshll.u32 %s1562_s24, 5 }
 0x128   : > { %v612_v1 = vsel %vm610_vm5, %v609_v63, %v561_v0  ;;  %v572_v2 = vpop.permute.xlu1 %571  ;;  %s435_s25 = scalar_lea.vmem %s1748_s2, %s1159_s14  ;;  %s1347_s14 = sshll.u32 %s1429_s3, 4  ;;  %s1348_s14 = int_to_ptr.vmem [resolvable:$false] %s1347_s14 }
 0x129   : > { %v615_v4 = vsel %vm613_vm6, %v612_v1, %v565_v60  ;;  %v732_v60 = vstv %s437_s0  ;;  %s1773_s0 = smov 8  }
 0x12a   : > { %1185 = vmatpush3.bf16.msra.mxu0 %v615_v4  ;;  %v813_v4 = vld [vmem:[%s1753_s7] sm:$0xff] }
 0x12b   : > { %v568_v6 = vpop.permute.xlu0 %567  ;;  %1186 = vmatprep.subr.bf16.mxu0 %v1418_v20  ;;  %669 = vperm.xlu1 %1322, %v661_v3  }
 0x12c   : > { %v579_v7 = vpop.permute.xlu1 %578  ;;  %v619_v8 = vsel %vm606_vm4, %v568_v6, %v572_v2 }
 0x12f   : > { %v576_v10 = vpop.permute.xlu0 %575 }
 0x130   : > { %v621_v11 = vsel %vm610_vm5, %v619_v8, %v576_v10  ;;  %v587_v14 = vpop.permute.xlu1 %586  ;;  %v923_v8 = vld [vmem:[%s1755_s9] sm:$0xff] }
 0x131   : > { %v623_v13 = vsel %vm613_vm6, %v621_v11, %v579_v7  ;;  %v1251_v10 = vpack.c.bf16 %v924_v9, %v923_v8 }
 0x132   : > { %1187 = vmatpush3.bf16.msra.mxu0 %v623_v13 }
 0x133   : > { %v581_v16 = vpop.permute.xlu0 %580  ;;  %1188 = vmatprep.subr.bf16.mxu0 %v1418_v20 }
 0x134   : > { %v627_v17 = vsel %vm606_vm4, %v581_v16, %v583_v15  ;;  %v594_v12 = vpop.permute.xlu1 %593 }
 0x135   : > { %v630_v18 = vsel %vm628_vm7, %v627_v17, %v587_v14 }
 0x136   : > { %1189 = vmatpush3.bf16.msra.mxu0 %v630_v18 }
 0x137   : > { %v590_v19 = vpop.permute.xlu0 %589  ;;  %1190 = vmatprep.subr.bf16.mxu0 %v1418_v20 }
 0x138   : > { %v635_v21 = vsel %vm632_vm3, %v590_v19, %v594_v12  ;;  %v601_v24 = vpop.permute.xlu1 %600 }
 0x13b   : > { %v597_v22 = vpop.permute.xlu0 %596 }
 0x13c   : > { %v637_v23 = vsel %vm613_vm6, %v635_v21, %v597_v22  ;;  %v641_v25 = vsel %vm639_vm8, %v597_v22, %v601_v24 }
 0x13d   : > { %1191 = vmatpush3.bf16.msra.mxu0 %v637_v23 }
 0x13e   : > { %1192 = vmatprep.subr.bf16.mxu0 %v1418_v20 }
 0x13f   : > { %v605_v26 = vpop.permute.xlu0 %604 }
 0x140   : > { %v643_v27 = vsel %vm610_vm5, %v641_v25, %v605_v26  ;;  %v926_v26 = vstv %s1139_s30 }
 0x150   : > { %v665_v33 = vpop.permute.xlu0 %664 }
 0x199   : > { %v653_v28 = vpop.permute.xlu1 %652 }
 0x19a   : > { %v656_v29 = vsel %vm654_vm9, %v643_v27, %v653_v28  ;;  %v681_v30 = vsel %vm628_vm7, %v653_v28, 0  ;;  %v1001_v27 = vld [vmem:[%s435_s25] sm:$0xff] }
 0x19b   : > { %1193 = vmatpush3.bf16.msra.mxu0 %v656_v29  ;;  %v1002_v29 = vld [vmem:[%s435_s25 + $0x8] sm:$0xff] }
 0x19c   : > { %1194 = vmatprep.subr.bf16.mxu0 %v1418_v20 }
 0x19f   : > { %1195 = vmatpush3.bf16.msra.mxu0 %v681_v30  ;;  %v1003_v30 = vld [vmem:[%s435_s25 + $0x10] sm:$0xff] }
 0x1a2   : > { %1197 = vmatmul.mubr.msk.bf16.vlgmr.msra.gmra.mrb[0].mxu0 %vm677_vm10, %v1323_v31  ;;  %v1004_v31 = vld [vmem:[%s435_s25 + $0x18] sm:$0xff] }
 0x1aa   : > { %v670_v36 = vpop.permute.xlu1 %669 }
 0x275   : > { %v717_v34 = vpop.f32.mrb[0].mxu0 }
 0x276   : > { %v718_v37 = vadd.f32 %v717_v34, %v665_v33  ;;  %v1198_v38 = vpop.f32.mrb[1].mxu0 }
 0x277   : > { %v720_v39 = vpop.f32.mrb[2].mxu0 }
 0x278   : > { %v727_v40 = vmul.f32 %v726_v35, %v718_v37  ;;  %v721_v41 = vadd.f32 %v720_v39, %v670_v36  ;;  %v1199_v42 = vpop.f32.mrb[3].mxu0  ;;  %vm724_vm11 = vcmp.ge.f32.partialorder %v718_v37, 0.0 }
 0x27a   : > { %v728_v43 = vmul.f32 %v726_v35, %v721_v41  ;;  %vm725_vm12 = vcmp.ge.f32.partialorder %v721_v41, 0.0  ;;  %v729_v44 = vsel %vm724_vm11, %v718_v37, %v727_v40 }
 0x27c   : > { %v730_v45 = vsel %vm725_vm12, %v721_v41, %v728_v43 }
 0x27d   : > { %v1236_v46 = vpack.c.bf16 %v730_v45, %v729_v44 }
 0x27f   : > { %1237 = vmatpush3.bf16.msra.mxu1 %v1236_v46 }
 0x280   : > { %1238 = vmatprep.subr.bf16.mxu1 %v1428_v32 }
 0x282   : > { %1205 = vmatmul.mubr.msk.f32.vlgmr.msra.gmra.mrb[0].mxu1 %vm733_vm13, %v731_v47 }
 0x283   : > { %1223 = vmatprep.mubr.msk.f32.mxu1 %vm1425_vm2, %v1418_v20  ;;  %1240 = vmatpush3.bf16.msra.mxu1 %v1239_v50 }
 0x284   : > { %1241 = vmatprep.subr.bf16.mxu1 %v1428_v32 }
 0x287   : > { %1243 = vmatpush3.bf16.msra.mxu1 %v1242_v53 }
 0x288   : > { %1244 = vmatprep.subr.bf16.mxu1 %v1428_v32 }
 0x28b   : > { %1246 = vmatpush3.bf16.msra.mxu1 %v1245_v56 }
 0x28c   : > { %1247 = vmatprep.subr.bf16.mxu1 %v1428_v32 }
 0x28f   : > { %1249 = vmatpush3.bf16.msra.mxu1 %v1248_v59 }
 0x290   : > { %1250 = vmatprep.subr.bf16.mxu1 %v1428_v32 }
 0x355   : > { %v803_v61 = vpop.f32.mrb[0].mxu1 }
 0x356   : > { %v804_v62 = vadd.f32 %v803_v61, %v732_v60  ;;  %v1206_v63 = vpop.f32.mrb[1].mxu1 }
 0x358   : > { %v1150_v0 = vmul.f32 -1.442695, %v804_v62 }
 0x35a   : > { %1324 = vpow2.f32 %v1150_v0 }
 0x364   : > { %v1325_v1 = vpop.eup %1324 }
 0x365   : > { %v810_v2 = vadd.f32 1.0, %v1325_v1 }
 0x367   : > { %1326 = vrcp.f32 %v810_v2 }
 0x371   : > { %v1327_v3 = vpop.eup %1326 }
 0x372   : > { %v817_v6 = vrot.slane %v1327_v3, %v1571_v5  ;;  %v925_v5 = vld [vmem:[%s1755_s9 + $0x10] sm:$0xff] }
 0x374   : > { %v818_v7 = vmul.f32 %v817_v6, %v813_v4 }
 0x376   : > { %1224 = vmatmul.mubr.msk.f32.vlgmr.msra.gmra.mrb[2].mxu1 %vm827_vm14, %v818_v7 }
 0x377   : > { %1232 = vmatprep.mubr.msk.f32.mxu1 %vm1425_vm2, %v1418_v20  ;;  %1252 = vmatpush3.bf16.msra.mxu1 %v1251_v10 }
 0x378   : > { %1230 = vmatprep.subr.mxu1 %v1418_v20 }
 0x37b   : > { %1231 = vmatpush3.msra.mxu1 %v925_v5 }
 0x449   : > { %v897_v11 = vpop.f32.mrb[2].mxu1 }
 0x44a   : > { %v902_v13 = vrot.slane %v897_v11, 7  ;;  %v1225_v14 = vpop.f32.mrb[3].mxu1 }
 0x44c   : > { %v904_v15 = vsel %vm639_vm8, 0.0, %v902_v13  ;;  %v905_v16 = vsel %vm639_vm8, %v902_v13, 0.0 }
 0x44d   : > { %v908_v17 = vrot.slane %v904_v15, 1  ;;  %v909_v18 = vrot.slane %v905_v16, 1  ;;  %v914_v19 = vrot.slane %v904_v15, 2  ;;  %v915_v12 = vrot.slane %v905_v16, 2 }
 0x44f   : > { %v916_v20 = vsel %vm613_vm6, %v914_v19, %v915_v12  ;;  %v910_v21 = vsel %vm654_vm9, %v908_v17, %v909_v18 }
 0x450   : > { %917 = vrot.lane.b32.xlu0 %v916_v20, %s1772_s29  ;;  %911 = vrot.lane.b32.xlu1 %v910_v21, %s1773_s0  ;;  %s421_s29 = scalar_lea.vmem [#allocation5], %s1132_s15  ;;  %s1349_s15 = scalar_lea.vmem %s1348_s14, 1024 }
 0x451   : > { %s1028_s1 = sshll.u32 %s421_s29, 4  ;;  %s1702_s1 = int_to_ptr.vmem [resolvable:$true] %s1028_s1 }
 0x452   : > { %s1343_s30 = scalar_lea.vmem %s1702_s1, 512  ;;  %p1350_p13 = scmp.lt.s32.totalorder %s1702_s1, %s1348_s14 }
 0x453   : > { %p1344_p9 = scmp.ne.s32.totalorder %s1702_s1, %s1343_s30  ;;  %p1351_p0 = scmp.lt.s32.totalorder %s1349_s15, %s1343_s30 }
 0x455   : > { %p1345_p10 = pnand %p1344_p9, %p1529_p5  ;;  %p1352_p1 = por %p1351_p0, %p1350_p13 }
 0x457   : > { %p1346_p12 = pneg %p1345_p10 }
 0x459   : > { %p1353_p2 = pnand %p1352_p1, %p1346_p12 }
 0x4c2   : > { %v918_v22 = vpop.permute.xlu0 %917  ;;  %v912_v23 = vpop.permute.xlu1 %911 }
 0x4c3   : > { %v921_v24 = vsel %vm920_vm15, %v904_v15, %v912_v23 }
 0x4c4   : > { %v922_v25 = vsel %vm733_vm13, %v921_v24, %v918_v22 }
 0x4c5   : > { %1233 = vmatmul.mubr.msk.f32.vlgmr.msra.gmra.mrb[4].mxu1 %vm927_vm0, %v922_v25 }
 0x598   : > { %v997_v28 = vpop.f32.mrb[4].mxu1 }
 0x599   : > { %v998_v32 = vadd.f32 %v997_v28, %v926_v26  ;;  %v1234_v33 = vpop.f32.mrb[5].mxu1 }
 0x59b   : > { %v1005_v34 = vmul.f32 %v1001_v27, %v998_v32  ;;  %v1006_v35 = vmul.f32 %v1002_v29, %v998_v32  ;;  %v1007_v36 = vmul.f32 %v1003_v30, %v998_v32  ;;  %v1008_v37 = vmul.f32 %v1004_v31, %v998_v32 }
 0x59d   : > { %1010 = vst.msk [vmem:[%s421_s29] sm:$0xff] %vm1009_vm1, %v1005_v34  ;;  %1011 = vst.msk [vmem:[%s421_s29 + $0x8] sm:$0xff] %vm1009_vm1, %v1006_v35 }
 0x59e   : > { %1012 = vst.msk [vmem:[%s421_s29 + $0x10] sm:$0xff] %vm1009_vm1, %v1007_v36  ;;  %1013 = vst.msk [vmem:[%s421_s29 + $0x18] sm:$0xff] %vm1009_vm1, %v1008_v37 }
 0x59f   : > { %1356 = shalt.err (!%p1353_p2)
}
 0x5a0   : > { %s1357_s12 = scalar_lea.hbm %s1700_s4, 512  ;;  %s1361_s25 = scalar_lea.hbm %s1757_s11, 1024 }
 0x5a1   : > { %p1358_p3 = scmp.ne.s32.totalorder %s1700_s4, %s1357_s12  ;;  %p1362_p8 = scmp.lt.u32.totalorder %s1700_s4, %s1757_s11 }
 0x5a2   : > { %p1363_p11 = scmp.lt.u32.totalorder %s1361_s25, %s1357_s12  ;;  %p1365_p10 = scmp.lt.u32.totalorder %s1357_s12, %s1700_s4 }
 0x5a3   : > { %p1359_p4 = pnand %p1358_p3, %p1529_p5 }
 0x5a4   : > { %p1364_p9 = por %p1363_p11, %p1362_p8 }
 0x5a5   : > { %p1360_p7 = pneg %p1359_p4 }
 0x5a6   : > { %p1366_p12 = por %p1365_p10, %p1364_p9 }
 0x5a8   : > { %p1367_p13 = pnand %p1366_p12, %p1360_p7 }
 0x5aa   : > { %1370 = shalt.err (!%p1367_p13)
}
 0x5ab   : > { %s1430_s24 = smov 128  }
 0x5ac   : > { %1257 = dma.vmem_to_hbm [thread:$0]  (%p1529_p5), %s1702_s1, 512, %s1700_s4, %s1704_s21, %s1430_s24, %s1430_s24, %s1773_s0  }
 0x5ad PF: > { %p1269_p0 = scmp.ge.s32.totalorder %s1409_s20, 2  ;;  %s1043_s30 = sand.u32 1, %s1397_s17  }
 0x5ae   : > { %s1044_s3 = scalar_lea.sflag [#allocation3], %s1043_s30 }
 0x5af   : > { %p1264_p1 = pnand %p1269_p0, %p1533_p6 }
 0x5b1   : > { %1392 = dma.done.wait (!%p1264_p1), %s1044_s3, 512  }
 0x5b2   : > { %1394 = vsyncadd (!%p1264_p1), %s1044_s3, 4294966784  ;;  %p22_p2 = scmp.ge.s32.totalorder %s1516_s23, 4   ;;  %s1774_s17 = smov %s1401_s18 }
 0x5b3   : > { %s1775_s18 = smov %s1405_s19  ;;  %s1776_s19 = smov %s1527_s26 }
 0x5b4   : > { %s1777_s20 = smov %s1516_s23  ;;  %24 = sbr.rel (!%p22_p2) target bundleno = 9 (0x9), region = 113 }
 0x5bb   :  { %1049 = vsyncpa [#allocation3], 1 }
 0x5bc   :  { %1051 = vsyncpa [#allocation3 + $0x1], 1 }
 0x5bd   :  { %1052 = vsyncpa [#allocation4], 1 }
 0x5be   :  { %1054 = vsyncpa [#allocation4 + $0x1], 1 }

</bundles_post_ra>
